<compile_context>
chip_gen: v7x
topology: tpu7x:2x2x1
jax: 0.10.0
libtpu: 0.0.40
codegen_flags: <defaults>
</compile_context>

<pallas_src>
import jax
import jax.numpy as jnp
from jax.experimental import pallas as pl
from jax.experimental.pallas import tpu as pltpu


def _round_up(x, m):
    return ((x + m - 1) // m) * m


def _block_byte_budget():
    """Generation-aware per-output-block byte budget (Pallas double-buffers it)."""
    try:
        cap = int(pltpu.get_tpu_info().vmem_capacity_bytes)
    except Exception:
        cap = None
    if cap is not None and cap <= 96 * 1024 * 1024:
        # v7x-class: 64 MiB physical / 32 MiB scoped per TC -> 2 x 8 MiB = 16 MiB.
        return 8 * 1024 * 1024
    # v5e / v6e: 128 MiB physical; v5e's scoped default is 16 MiB -> 2 x 6 = 12 MiB,
    # so no vmem_limit_bytes override is needed on any generation.
    return 6 * 1024 * 1024


def weight_norm_forward(x, asset_weights, out_dtype=None):
    """Pallas WeightNorm forward.

    Parameters
    ----------
    x : jnp.ndarray
        Shape (n_samples, dim_1, ..., dim_N). Only x.shape[0] is used.
    asset_weights : jnp.ndarray
        Shape (n_assets,), the learnable parameter.
    out_dtype : optional dtype
        Output dtype (e.g. jnp.bfloat16 to halve HBM write-back). Defaults to
        asset_weights.dtype for exact parity with the reference.

    Returns
    -------
    jnp.ndarray of shape (n_samples, n_assets).
    """
    n_samples = int(x.shape[0])
    n_assets = int(asset_weights.shape[0])
    out_dt = jnp.dtype(out_dtype) if out_dtype is not None else jnp.dtype(asset_weights.dtype)
    itemsize = out_dt.itemsize

    # ---- lane packing: present a lane-dense (>=128-wide) output slab -------
    if n_assets % 128 == 0:
        pack = 1                       # already lane-dense
    elif 128 % n_assets == 0:
        pack = 128 // n_assets         # e.g. 8 for n_assets=16
    else:
        pack = 1
        # TODO(synk): n_assets that neither divides nor is a multiple of 128
        # falls back to masked (partial-lane) stores.
    width = n_assets * pack

    padded_samples = _round_up(n_samples, pack)
    packed_rows = padded_samples // pack

    # ---- row tiling: multiple of the sublane quantum, sized by byte budget --
    sub = {4: 8, 2: 16, 1: 32}.get(itemsize, 8)
    row_bytes = width * itemsize
    budget_rows = max(sub, (_block_byte_budget() // row_bytes) // sub * sub)
    tile_r = min(packed_rows, budget_rows)

    # v7x megacore: if everything would land in one tile but the work is large
    # enough that each half still gives a >=2 MiB block, split into 2 steps so
    # dimension_semantics=("parallel",) actually shards across both TCs.
    min_split_rows = max(sub, _round_up(max(1, (2 * 1024 * 1024) // row_bytes), sub))
    if tile_r >= packed_rows and packed_rows >= 2 * min_split_rows:
        tile_r = _round_up((packed_rows + 1) // 2, sub)

    grid_m = (packed_rows + tile_r - 1) // tile_r

    def kernel(w_ref, out_ref):
        # w_ref:   (1, width) resident weight tile (constant index_map -> one DMA).
        # out_ref: (tile_r, width) lane-dense output tile.
        w = w_ref[...].astype(jnp.float32)                        # compute in f32
        clamped = jnp.maximum(w, 0.0)                             # torch.clamp(min=0)
        # Sum only the first n_assets lanes (the weights are lane-replicated
        # `pack` times), matching the reference sum over exactly n_assets terms.
        lane = jax.lax.broadcasted_iota(jnp.int32, (1, width), 1)
        total = jnp.sum(jnp.where(lane < n_assets, clamped, 0.0),
                        axis=1, keepdims=True)                    # (1, 1)
        normalized = clamped / total                              # (1, width)
        row = normalized.astype(out_ref.dtype)                    # cast BEFORE broadcast
        out_ref[...] = jnp.broadcast_to(row, out_ref.shape)       # replicated-vreg stores

    # Wrapper-side layout plumbing only (tiny, one-time): lane-replicate the
    # (1, n_assets) weight vector so the kernel works on a 128-wide vreg.
    w2d = asset_weights.reshape(1, n_assets)
    if pack > 1:
        w2d = jnp.tile(w2d, (1, pack))

    cost = pl.CostEstimate(
        flops=3 * width,
        transcendentals=0,
        bytes_accessed=int(packed_rows) * width * itemsize
        + width * jnp.dtype(asset_weights.dtype).itemsize,
    )

    out_packed = pl.pallas_call(
        kernel,
        out_shape=jax.ShapeDtypeStruct((packed_rows, width), out_dt),
        grid_spec=pltpu.PrefetchScalarGridSpec(
            num_scalar_prefetch=0,
            grid=(grid_m,),
            in_specs=[pl.BlockSpec((1, width), lambda i: (0, 0))],      # resident weights
            out_specs=pl.BlockSpec((tile_r, width), lambda i: (i, 0)),  # row tiles
        ),
        compiler_params=pltpu.CompilerParams(
            dimension_semantics=("parallel",),   # v7x: shard row tiles across 2 TCs
        ),
        cost_estimate=cost,
    )(w2d)

    # Free reshape (row-major contiguous).
    out = out_packed.reshape(padded_samples, n_assets)
    if padded_samples != n_samples:
        # TODO(synk): this prefix slice costs one extra HBM pass over the output;
        # it only triggers when n_samples is not a multiple of pack (=128//n_assets).
        # Pack-aligned batch sizes take the zero-copy path above.
        out = out[:n_samples]
    return out


def weight_norm_reference(x, asset_weights):
    clamped = jnp.maximum(asset_weights, 0.0)
    normalized = clamped / jnp.sum(clamped)
    return jnp.broadcast_to(normalized[None, :], (x.shape[0], asset_weights.shape[0]))


if __name__ == "__main__":
    key = jax.random.PRNGKey(0)
    k_x, k_w = jax.random.split(key)

    n_samples, n_channels, lookback, n_assets = 2, 4, 16, 16

    # x: (n_samples, n_channels, lookback, n_assets) — deepdow NCHW-style input.
    x = jax.random.normal(k_x, (n_samples, n_channels, lookback, n_assets),
                          dtype=jnp.float32)

    # nn.Parameter(torch.ones(n_assets)) plus a small perturbation so the
    # clamp/normalize path is non-trivial.
    asset_weights = jnp.ones((n_assets,), dtype=jnp.float32) \
        + 0.5 * jax.random.normal(k_w, (n_assets,), dtype=jnp.float32)

    out = jax.block_until_ready(weight_norm_forward(x, asset_weights))
    ref = weight_norm_reference(x, asset_weights)
    assert out.shape == (n_samples, n_assets)
    assert jnp.allclose(out, ref, atol=1e-6, rtol=1e-6)
    assert jnp.allclose(jnp.sum(out, axis=-1), 1.0, atol=1e-5)

    # Pack-aligned batch (zero-copy path, multi-row tile).
    n1 = 4096
    x1 = jnp.zeros((n1, 1), dtype=jnp.float32)   # only shape[0] is consulted
    out1 = jax.block_until_ready(weight_norm_forward(x1, asset_weights))
    ref1 = weight_norm_reference(x1, asset_weights)
    assert out1.shape == (n1, n_assets)
    assert jnp.allclose(out1, ref1, atol=1e-6, rtol=1e-6)

    # Ragged batch: exercises the row-padding/prefix-slice tail path.
    n2 = 4099
    x2 = jnp.zeros((n2, 1), dtype=jnp.float32)
    out2 = jax.block_until_ready(weight_norm_forward(x2, asset_weights))
    ref2 = weight_norm_reference(x2, asset_weights)
    assert out2.shape == (n2, n_assets)
    assert jnp.allclose(out2, ref2, atol=1e-6, rtol=1e-6)

    print("KERNEL_OK")
</pallas_src>

<mosaic_0001>
module attributes {stable_mosaic.version = 11 : i64} {
  func.func @kernel(%arg0: i32, %arg1: memref<1x128xf32, #tpu.memory_space<vmem>>, %arg2: memref<1x128xf32, #tpu.memory_space<vmem>>) attributes {dimension_semantics = [#tpu.dimension_semantics<parallel>], iteration_bounds = array<i64: 1>, scalar_prefetch = 0 : i64, scratch_operands = 0 : i64, tpu.core_type = #tpu.core_type<tc>, window_params = [{pipeline_mode = #tpu.pipeline_mode<synchronous>, transform_indices = @transform_0, window_bounds = array<i64: 1, 128>}, {transform_indices = @transform_1, window_bounds = array<i64: 1, 128>}]} {
    %c0 = arith.constant 0 : index
    %c0_0 = arith.constant 0 : index
    %0 = vector.load %arg1[%c0, %c0_0] : memref<1x128xf32, #tpu.memory_space<vmem>>, vector<1x128xf32>
    %cst = arith.constant 0.000000e+00 : f32
    %1 = vector.broadcast %cst : f32 to vector<1x128xf32>
    %2 = arith.maximumf %0, %1 : vector<1x128xf32>
    %3 = tpu.iota {dimensions = array<i32: 1>} : vector<1x128xi32>
    %c16_i32 = arith.constant 16 : i32
    %4 = vector.broadcast %c16_i32 : i32 to vector<1x128xi32>
    %5 = arith.cmpi slt, %3, %4 : vector<1x128xi32>
    %cst_1 = arith.constant 0.000000e+00 : f32
    %6 = vector.broadcast %cst_1 : f32 to vector<1x128xf32>
    %7 = arith.select %5, %2, %6 : vector<1x128xi1>, vector<1x128xf32>
    %cst_2 = arith.constant dense<0.000000e+00> : vector<1xf32>
    %8 = vector.multi_reduction <add>, %7, %cst_2 [1] : vector<1x128xf32> to vector<1xf32>
    %9 = vector.shape_cast %8 : vector<1xf32> to vector<1x1xf32>
    %10 = vector.broadcast %9 : vector<1x1xf32> to vector<1x128xf32>
    %11 = arith.divf %2, %10 : vector<1x128xf32>
    %c0_3 = arith.constant 0 : index
    %c0_4 = arith.constant 0 : index
    %12 = vector.load %arg2[%c0_3, %c0_4] : memref<1x128xf32, #tpu.memory_space<vmem>>, vector<1x128xf32>
    tpu.vector_store %arg2[%c0_3, %c0_4], %11 {strides = array<i32>} : memref<1x128xf32, #tpu.memory_space<vmem>>, vector<1x128xf32>,
    return
  }
  func.func @transform_0(%arg0: i32) -> (i32, i32) {
    %c0_i32 = arith.constant 0 : i32
    %c0_i32_0 = arith.constant 0 : i32
    %c0_i32_1 = arith.constant 0 : i32
    return %c0_i32, %c0_i32_0 : i32, i32
  }
  func.func @transform_1(%arg0: i32) -> (i32, i32) {
    %c0_i32 = arith.constant 0 : i32
    %c0_i32_0 = arith.constant 0 : i32
    return %arg0, %c0_i32 : i32, i32
  }
}

</mosaic_0001>

<bundles_post_ra>
// kernel: tpu_custom_call.1
= control target key start
LH: loop header
LB: loop body
LE: loop exit
PB: predicated region body
PF: predicated region fallthrough
CT: control target
= control target key end

     0   :  { %6 = vsyncpa [#allocation3], 0  ;;  %s137_s0 = inlined_call_operand.hbm [shape: f32[1,128], index: 0, kind: input, shape index: {}]   ;;  %s138_s1 = inlined_call_operand.hbm [shape: f32[1,128], index: 1, kind: output, shape index: {}]  }
   0x1   :  { %7 = vsyncpa [#allocation4], 0  ;;  %s101_s6 = smov [#allocation2]   ;;  %s53_s10 = scalar_lea.hbm %s137_s0, 16 }
   0x2   :  { %s14_s7 = sshll.u32 %s101_s6, 4  ;;  %p54_p0 = scmp.ne.s32.totalorder %s137_s0, %s53_s10  ;;  %s15_s7 = int_to_ptr.vmem [resolvable:$true] %s14_s7 }
   0x3   :  { %p57_p1 = scmp.lt.u32.totalorder %s53_s10, %s137_s0 }
   0x5   :  { %p59_p2 = pnand %p57_p1, %p54_p0 }
   0x7   :  { %62 = shalt.err (!%p59_p2)
}
   0x8   :  { %s63_s15 = scalar_lea.vmem %s15_s7, 16  ;;  %s67_s16 = scalar_lea.vmem %s15_s7, 32 }
   0x9   :  { %p64_p3 = scmp.ne.s32.totalorder %s15_s7, %s63_s15  ;;  %p68_p4 = scmp.lt.s32.totalorder %s15_s7, %s15_s7 }
   0xa   :  { %p69_p5 = scmp.lt.s32.totalorder %s67_s16, %s63_s15 }
   0xc   :  { %p70_p6 = por %p69_p5, %p68_p4 }
   0xe   :  { %p71_p7 = pnand %p70_p6, %p64_p3 }
  0x10   :  { %74 = shalt.err (!%p71_p7)
}
  0x11   :  { %17 = dma.hbm_to_vmem [thread:$0]  %s137_s0, 16, %s15_s7, [#allocation3]  }
  0x12   :  { %97 = dma.done.wait [#allocation3], 16  }
  0x13   :  { %98 = vsyncadd [#allocation3], 4294967280  ;;  %v23_v0 = vlaneseq  ;;  %v21_v2 = vld [vmem:[#allocation2] sm:$0x1]  ;;  %vm27_vm1 = vcmask 1040384   ;;  %s102_s19 = smov [#allocation5]  }
  0x14   :  { %v22_v3 = vmax.f32 %v21_v2, 0.0  ;;  %s40_s20 = sshll.u32 %s102_s19, 4  ;;  %s41_s20 = int_to_ptr.vmem [resolvable:$true] %s40_s20 }
  0x15   :  { %v24_v1 = vand.u32 127, %v23_v0  ;;  %s75_s0 = scalar_lea.vmem %s41_s20, 16  ;;  %s79_s21 = scalar_lea.vmem %s41_s20, 32 }
  0x16   :  { %p76_p8 = scmp.ne.s32.totalorder %s41_s20, %s75_s0  ;;  %p80_p9 = scmp.lt.s32.totalorder %s41_s20, %s41_s20 }
  0x17   :  { %vm25_vm0 = vcmp.lt.s32.totalorder %v24_v1, 16  ;;  %p81_p10 = scmp.lt.s32.totalorder %s79_s21, %s75_s0 }
  0x18   :  { %v26_v4 = vsel %vm25_vm0, %v22_v3, 0.0 }
  0x19   :  { %v28_v5 = vsel %vm27_vm1, %v26_v4, 0.0  ;;  %p82_p11 = por %p81_p10, %p80_p9 }
  0x1a   :  { %29 = vadd.xlane.f32.xlu0 %v28_v5 }
  0x1b   :  { %p83_p12 = pnand %p82_p11, %p76_p8 }
  0xa7   :  { %v30_v6 = vpop.xlane.xlu0 %29 }
  0xa8   :  { %51 = vrcp.f32 %v30_v6 }
  0xb2   :  { %v52_v7 = vpop.eup %51 }
  0xb3   :  { %v32_v8 = vmul.f32 %v52_v7, %v22_v3 }
  0xb5   :  { %33 = vst [vmem:[#allocation5] sm:$0x1] %v32_v8 }
  0xb6   :  { %86 = shalt.err (!%p83_p12)
}
  0xb7   :  { %s87_s24 = scalar_lea.hbm %s138_s1, 16 }
  0xb8   :  { %p88_p13 = scmp.ne.s32.totalorder %s138_s1, %s87_s24  ;;  %p91_p0 = scmp.lt.u32.totalorder %s87_s24, %s138_s1 }
  0xba   :  { %p93_p1 = pnand %p91_p0, %p88_p13 }
  0xbc   :  { %96 = shalt.err (!%p93_p1)
}
  0xbd   :  { %43 = dma.vmem_to_hbm [thread:$0]  %s41_s20, 16, %s138_s1, [#allocation4]  }
  0xbe   :  { %99 = dma.done.wait [#allocation4], 16  }
  0xbf   :  { %100 = vsyncadd [#allocation4], 4294967280 }
  0xc0   :  { %47 = vsyncpa [#allocation3], 1 }
  0xc1   :  { %48 = vsyncpa [#allocation4], 1 }

</bundles_post_ra>
